<compile_context>
chip_gen: v7x
topology: tpu7x:2x2x1
jax: 0.10.0
libtpu: 0.0.40
codegen_flags: <defaults>
</compile_context>

<pallas_src>
import functools

import jax
import jax.numpy as jnp
from jax.scipy.linalg import cho_solve
from jax.experimental import pallas as pl
from jax.experimental.pallas import tpu as pltpu

_F32 = 4
_MIB = 1024 * 1024


def _vmem_capacity_bytes():
    """Physical VMEM per TensorCore; conservative (v7x = 64 MiB) fallback."""
    try:
        return int(pltpu.get_tpu_info().vmem_capacity_bytes)
    except Exception:
        return 64 * _MIB


def _row_tile(N, cap):
    """Largest multiple-of-8 divisor of N that is <= cap (never a full N x N
    plane unless N itself is not a multiple of 8)."""
    start = (min(cap, N) // 8) * 8
    for tm in range(start, 7, -8):
        if N % tm == 0:
            return tm
    return N  # N not a multiple of 8 (tiny / pathological problems only)


def _slab_cap(N, budget_bytes, rows_of_slabs, cap_hi):
    """Row-slab cap so that ~rows_of_slabs (tm, N) f32 slabs fit the budget."""
    per_row = rows_of_slabs * N * _F32
    cap = max(8, min(cap_hi, budget_bytes // per_row))
    return (cap // 8) * 8


# ----------------------------------------------------------------------------
# Kernel 1: squared-exponential kernel matrix with the full regularizer folded
# in.  Emits a single HBM array:  Kreg = sigma^2*exp(-0.5*d2/alpha^2) + 2*eps*I
# Tiled over (output-dim, row-slab).
# ----------------------------------------------------------------------------
def _rbf_kernel(sigma_ref, alpha_ref, xr_ref, xct_ref, kreg_ref, *, jitter):
    d = pl.program_id(0)
    i = pl.program_id(1)

    xr = xr_ref[...].astype(jnp.float32)                   # (tm, D) row slab
    xct = xct_ref[...].astype(jnp.float32)                 # (D, N)  all points, K-major

    sq_r = jnp.sum(xr * xr, axis=-1, keepdims=True)        # (tm, 1)
    sq_c = jnp.sum(xct * xct, axis=0, keepdims=True)       # (1, N) lane-dense row
    # Tiny-K (K = D) matmul: HIGHEST precision is nearly free here and protects
    # the dist^2 cancellation for near-duplicate points.
    gram = jnp.dot(xr, xct, preferred_element_type=jnp.float32,
                   precision=jax.lax.Precision.HIGHEST)    # (tm, N)
    dist2 = jnp.maximum(sq_r + sq_c - 2.0 * gram, 0.0)

    # Scalar hyper-parameter math stays on the scalar path; the N^2 vector path
    # only sees one multiply feeding the (EUP-bound) exp.
    sigma = sigma_ref[d]
    alpha = alpha_ref[d]
    var = sigma * sigma
    scale = -0.5 / (alpha * alpha)
    k = var * jnp.exp(dist2 * scale)

    tm, N = dist2.shape
    row = jax.lax.broadcasted_iota(jnp.int32, (tm, N), 0) + i * tm
    col = jax.lax.broadcasted_iota(jnp.int32, (tm, N), 1)
    eye = (row == col).astype(jnp.float32)                 # VPU filler under MXU/EUP

    # Single HBM-resident kernel matrix (Kxx = Kreg - jitter*I downstream).
    kreg_ref[0, :, :] = k + (2.0 * jitter) * eye


def rbf_kernel_matrix(X, sigma, alpha, jitter):
    """Returns Kreg = k(X, X) + 2*jitter*I, shape (D_out, N, N) float32."""
    N, D = X.shape
    D_out = sigma.shape[0]
    vmem_cap = _vmem_capacity_bytes()

    # ~10 (tm, N) f32 slabs (double-buffered output + exp/iota temps) in half
    # of VMEM; keeps v5e's scoped default happy and v7x within 64 MiB.
    tm = _row_tile(N, _slab_cap(N, vmem_cap // 2, rows_of_slabs=10, cap_hi=256))

    working = (2 * tm * max(D, 128) * _F32      # X row slab (x2 buffers)
               + 2 * 8 * max(N, 128) * _F32     # X^T (D on sublanes)
               + 2 * tm * N * _F32              # Kreg output slab (x2 buffers)
               + 8 * tm * N * _F32)             # dist2 / exp / iota temps
    vmem_limit = int(min(max(32 * _MIB, 1.25 * working + 4 * _MIB),
                         min(128 * _MIB, vmem_cap)))

    XT = X.T  # (D, N): lane-dense column side, no in-kernel transpose
    kernel = functools.partial(_rbf_kernel, jitter=jitter)
    return pl.pallas_call(
        kernel,
        out_shape=jax.ShapeDtypeStruct((D_out, N, N), jnp.float32),
        grid=(D_out, N // tm),
        in_specs=[
            pl.BlockSpec(memory_space=pltpu.MemorySpace.SMEM),   # sigma (D_out,)
            pl.BlockSpec(memory_space=pltpu.MemorySpace.SMEM),   # alpha (D_out,)
            pl.BlockSpec((tm, D), lambda d, i: (i, 0)),          # X row slab
            pl.BlockSpec((D, N), lambda d, i: (0, 0)),           # X^T (column side)
        ],
        out_specs=pl.BlockSpec((1, tm, N), lambda d, i: (d, i, 0)),
        compiler_params=pltpu.CompilerParams(
            dimension_semantics=("parallel", "parallel"),
            vmem_limit_bytes=vmem_limit),
    )(sigma, alpha, X, XT)


# ----------------------------------------------------------------------------
# Kernel 2: posterior mean / covariance, tiled over (D_out, row-slab).
#   B   = Kxx[slab] @ Kinv = Kreg[slab] @ Kinv - jitter*Kinv[slab]
#   cov = Kxx + jitter*I - B @ Kxx = Kreg[slab] - B @ Kreg + jitter*B
#   mu  = sum(B * y_row, -1)          (VPU mul + lane reduce, no 1-lane matvec)
# The row slabs are sliced out of the resident full planes (no duplicate
# slab input streams from HBM).
# ----------------------------------------------------------------------------
def _posterior_kernel(kreg_ref, kinv_ref, yrow_ref, mu_ref, cov_ref, *, jitter, tm):
    i = pl.program_id(1)
    row0 = pl.multiple_of(i * tm, tm)

    R = kreg_ref[0, :, :]                         # (N, N) full resident plane
    Kinv = kinv_ref[0, :, :]                      # (N, N)
    Rs = kreg_ref[0, pl.ds(row0, tm), :]          # (tm, N) slab from resident plane
    Kinv_s = kinv_ref[0, pl.ds(row0, tm), :]      # (tm, N)
    y_row = yrow_ref[0, :, :]                     # (1, N) lane-dense y

    # DEFAULT f32 MXU precision on the two N^3 matmuls: validated at 1e-4
    # against the f32 reference; HIGHEST would roughly double MXU passes.
    B = jnp.dot(Rs, Kinv, preferred_element_type=jnp.float32,
                precision=jax.lax.Precision.DEFAULT) - jitter * Kinv_s
    cov_ref[0, :, :] = Rs - jnp.dot(
        B, R, preferred_element_type=jnp.float32,
        precision=jax.lax.Precision.DEFAULT) + jitter * B
    mu_ref[0, :, :] = jnp.sum(B * y_row, axis=-1, keepdims=True)


def gpr_posterior(Kreg, Kxx_inv, y_row, jitter):
    D_out, N, _ = Kreg.shape
    vmem_cap = _vmem_capacity_bytes()

    # The two full (N, N) planes only change along the outer D_out axis.  If
    # keeping them double-buffered would crowd VMEM (v7x: 64 MiB physical),
    # request single buffering -- we only lose overlap at D_out boundaries.
    plane_bytes_db = 2 * 2 * N * N * _F32
    single_buffer_planes = plane_bytes_db > int(0.6 * vmem_cap)
    plane_buffers = 1 if single_buffer_planes else 2
    plane_kwargs = {"pipeline_mode": pl.Buffered(1)} if single_buffer_planes else {}
    plane_bytes = 2 * plane_buffers * N * N * _F32
    # TODO(synk): for N where plane_bytes alone exceeds VMEM (v7x, N >~ 2.5K),
    # add a third grid axis over cov columns and stream Kreg in (N, tn) blocks.

    # Row-slab size from the VMEM left after the resident planes; v6e/v5e get
    # 512-row slabs for modest N, v7x stays <= 256.
    cap_hi = 512 if (vmem_cap >= 96 * _MIB and N <= 1536) else 256
    slab_budget = max(vmem_cap - plane_bytes - 8 * _MIB, 16 * N * _F32)
    tm = _row_tile(N, _slab_cap(N, slab_budget, rows_of_slabs=8, cap_hi=cap_hi))

    # Scoped-VMEM limit derived from the actual working set (generous margin).
    working = (plane_bytes
               + 8 * tm * N * _F32              # cov out (x2) + B + matmul temps
               + 2 * tm * 128 * _F32            # mu out (lane-padded)
               + 16 * max(N, 128) * _F32)       # y row
    vmem_limit = int(min(max(32 * _MIB, 1.25 * working + 4 * _MIB),
                         min(128 * _MIB, vmem_cap)))

    kernel = functools.partial(_posterior_kernel, jitter=jitter, tm=tm)
    return pl.pallas_call(
        kernel,
        out_shape=(
            jax.ShapeDtypeStruct((D_out, N, 1), jnp.float32),
            jax.ShapeDtypeStruct((D_out, N, N), jnp.float32),
        ),
        grid=(D_out, N // tm),
        in_specs=[
            pl.BlockSpec((1, N, N), lambda d, i: (d, 0, 0), **plane_kwargs),  # Kreg
            pl.BlockSpec((1, N, N), lambda d, i: (d, 0, 0), **plane_kwargs),  # Kinv
            pl.BlockSpec((1, 1, N), lambda d, i: (d, 0, 0)),                  # y row
        ],
        out_specs=(
            pl.BlockSpec((1, tm, 1), lambda d, i: (d, i, 0)),
            pl.BlockSpec((1, tm, N), lambda d, i: (d, i, 0)),
        ),
        compiler_params=pltpu.CompilerParams(
            dimension_semantics=("parallel", "parallel"),
            vmem_limit_bytes=vmem_limit),
    )(Kreg, Kxx_inv, y_row)


# ----------------------------------------------------------------------------
# GPR forward (mirrors GPR.forward in the PyTorch module).
# ----------------------------------------------------------------------------
def gpr_forward(X, y, sigma, alpha, jitter=0.001):
    """X: (N, D) f32, y: (D_out, N, 1) f32. Returns (mu, cov)."""
    N, _ = X.shape
    D_out = sigma.shape[0]
    Kreg = rbf_kernel_matrix(X, sigma, alpha, jitter)        # k + 2*jitter*I (SPD)
    # Batched SPD inverse via Cholesky + two triangular solves (cheaper and
    # better conditioned than LU inv at large N).
    # TODO(synk): no Pallas primitive for batched Cholesky / triangular solve;
    # this factorization stays in plain JAX (XLA).
    L = jnp.linalg.cholesky(Kreg)
    eye = jnp.broadcast_to(jnp.eye(N, dtype=jnp.float32), (D_out, N, N))
    Kxx_inv = cho_solve((L, True), eye)
    y_row = jnp.reshape(y, (D_out, 1, N))                    # lane-dense view of y
    mu, cov = gpr_posterior(Kreg, Kxx_inv, y_row, jitter)
    return mu, cov


# ----------------------------------------------------------------------------
# Pure-JAX reference for a correctness check (matches the PyTorch module).
# ----------------------------------------------------------------------------
def gpr_forward_ref(X, y, sigma, alpha, jitter=0.001):
    sq = jnp.sum(X * X, axis=-1)
    d2 = jnp.maximum(sq[:, None] + sq[None, :] - 2.0 * (X @ X.T), 0.0)
    K_raw = (sigma[:, None, None] ** 2) * jnp.exp(
        -0.5 * d2[None, :, :] / (alpha[:, None, None] ** 2))
    N = X.shape[0]
    eye = jnp.eye(N, dtype=jnp.float32)[None]
    Kxx = K_raw + jitter * eye
    Kxx_inv = jnp.linalg.inv(Kxx + jitter * eye)
    KtKinv = jnp.einsum("dji,djk->dik", Kxx, Kxx_inv)
    mu = KtKinv @ y
    cov = Kxx + jitter * eye - KtKinv @ Kxx
    return mu, cov


if __name__ == "__main__":
    key = jax.random.PRNGKey(0)
    N, D, D_out = 8, 4, 2

    kx, ky = jax.random.split(key)
    X = jax.random.normal(kx, (N, D), dtype=jnp.float32)
    y = jax.random.normal(ky, (D_out, N, 1), dtype=jnp.float32)

    # Deterministic SquaredExp-style kernel hyperparameters (one per output dim).
    sigma = 1.0 + 0.1 * jnp.arange(D_out, dtype=jnp.float32)
    alpha = 1.0 + 0.05 * jnp.arange(D_out, dtype=jnp.float32)
    noise_std = jnp.float32(1.0)  # nn.Parameter in the module; unused in forward.

    mu, cov = jax.jit(gpr_forward)(X, y, sigma, alpha)
    jax.block_until_ready((mu, cov))

    mu_ref, cov_ref = gpr_forward_ref(X, y, sigma, alpha)
    assert mu.shape == (D_out, N, 1) and cov.shape == (D_out, N, N)
    assert jnp.allclose(mu, mu_ref, atol=1e-4, rtol=1e-4)
    assert jnp.allclose(cov, cov_ref, atol=1e-4, rtol=1e-4)

    print("KERNEL_OK")
</pallas_src>

<mosaic_0001>
module attributes {stable_mosaic.version = 11 : i64} {
  func.func @_rbf_kernel(%arg0: i32, %arg1: i32, %arg2: memref<2xf32, #tpu.memory_space<smem>>, %arg3: memref<2xf32, #tpu.memory_space<smem>>, %arg4: memref<8x4xf32, #tpu.memory_space<vmem>>, %arg5: memref<4x8xf32, #tpu.memory_space<vmem>>, %arg6: memref<1x8x8xf32, #tpu.memory_space<vmem>>) attributes {dimension_semantics = [#tpu.dimension_semantics<parallel>, #tpu.dimension_semantics<parallel>], iteration_bounds = array<i64: 2, 1>, scalar_prefetch = 0 : i64, scratch_operands = 0 : i64, tpu.core_type = #tpu.core_type<tc>, window_params = [{transform_indices = @transform_0, window_bounds = array<i64: 2>}, {transform_indices = @transform_1, window_bounds = array<i64: 2>}, {transform_indices = @transform_2, window_bounds = array<i64: 8, 4>}, {pipeline_mode = #tpu.pipeline_mode<synchronous>, transform_indices = @transform_3, window_bounds = array<i64: 4, 8>}, {transform_indices = @transform_4, window_bounds = array<i64: 1, 8, 8>}]} {
    %c0 = arith.constant 0 : index
    %c0_0 = arith.constant 0 : index
    %0 = vector.load %arg4[%c0, %c0_0] : memref<8x4xf32, #tpu.memory_space<vmem>>, vector<8x4xf32>
    %c0_1 = arith.constant 0 : index
    %c0_2 = arith.constant 0 : index
    %1 = vector.load %arg5[%c0_1, %c0_2] : memref<4x8xf32, #tpu.memory_space<vmem>>, vector<4x8xf32>
    %2 = arith.mulf %0, %0 : vector<8x4xf32>
    %cst = arith.constant dense<0.000000e+00> : vector<8xf32>
    %3 = vector.multi_reduction <add>, %2, %cst [1] : vector<8x4xf32> to vector<8xf32>
    %4 = vector.shape_cast %3 : vector<8xf32> to vector<8x1xf32>
    %5 = arith.mulf %1, %1 : vector<4x8xf32>
    %cst_3 = arith.constant dense<0.000000e+00> : vector<8xf32>
    %6 = vector.multi_reduction <add>, %5, %cst_3 [0] : vector<4x8xf32> to vector<8xf32>
    %7 = vector.shape_cast %6 : vector<8xf32> to vector<1x8xf32>
    %cst_4 = arith.constant dense<0.000000e+00> : vector<8x8xf32>
    %8 = tpu.matmul %0, %1, %cst_4 {dimension_numbers = #tpu.dot_dimension_numbers<[1], [0], [0], [1], [0, 0, 1, 1], [], []>, precision = #tpu.contract_precision<fp32>} : vector<8x4xf32>, vector<4x8xf32>, vector<8x8xf32> -> vector<8x8xf32>
    %9 = vector.broadcast %4 : vector<8x1xf32> to vector<8x8xf32>
    %10 = vector.broadcast %7 : vector<1x8xf32> to vector<8x8xf32>
    %11 = arith.addf %9, %10 : vector<8x8xf32>
    %cst_5 = arith.constant 2.000000e+00 : f32
    %12 = vector.broadcast %cst_5 : f32 to vector<8x8xf32>
    %13 = arith.mulf %12, %8 : vector<8x8xf32>
    %14 = arith.subf %11, %13 : vector<8x8xf32>
    %cst_6 = arith.constant 0.000000e+00 : f32
    %15 = vector.broadcast %cst_6 : f32 to vector<8x8xf32>
    %16 = arith.maximumf %14, %15 : vector<8x8xf32>
    %17 = arith.index_cast %arg0 : i32 to index
    %18 = memref.load %arg2[%17] : memref<2xf32, #tpu.memory_space<smem>>
    %19 = arith.index_cast %arg0 : i32 to index
    %20 = memref.load %arg3[%19] : memref<2xf32, #tpu.memory_space<smem>>
    %21 = arith.mulf %18, %18 : f32
    %22 = arith.mulf %20, %20 : f32
    %cst_7 = arith.constant -5.000000e-01 : f32
    %23 = arith.divf %cst_7, %22 : f32
    %24 = vector.broadcast %23 : f32 to vector<8x8xf32>
    %25 = arith.mulf %16, %24 : vector<8x8xf32>
    %26 = math.exp %25 : vector<8x8xf32>
    %27 = vector.broadcast %21 : f32 to vector<8x8xf32>
    %28 = arith.mulf %27, %26 : vector<8x8xf32>
    %29 = tpu.iota {dimensions = array<i32: 0>} : vector<8x8xi32>
    %c8_i32 = arith.constant 8 : i32
    %30 = arith.muli %arg1, %c8_i32 : i32
    %31 = vector.broadcast %30 : i32 to vector<8x8xi32>
    %32 = arith.addi %29, %31 : vector<8x8xi32>
    %33 = tpu.iota {dimensions = array<i32: 1>} : vector<8x8xi32>
    %34 = arith.cmpi eq, %32, %33 : vector<8x8xi32>
    %35 = arith.extui %34 : vector<8x8xi1> to vector<8x8xi32>
    %36 = arith.sitofp %35 : vector<8x8xi32> to vector<8x8xf32>
    %cst_8 = arith.constant 2.000000e-03 : f32
    %37 = vector.broadcast %cst_8 : f32 to vector<8x8xf32>
    %38 = arith.mulf %37, %36 : vector<8x8xf32>
    %39 = arith.addf %28, %38 : vector<8x8xf32>
    %c0_9 = arith.constant 0 : index
    %c0_10 = arith.constant 0 : index
    %c0_11 = arith.constant 0 : index
    %40 = vector.load %arg6[%c0_9, %c0_10, %c0_11] : memref<1x8x8xf32, #tpu.memory_space<vmem>>, vector<1x8x8xf32>
    %41 = vector.shape_cast %40 : vector<1x8x8xf32> to vector<8x8xf32>
    %42 = vector.shape_cast %39 : vector<8x8xf32> to vector<1x8x8xf32>
    tpu.vector_store %arg6[%c0_9, %c0_10, %c0_11], %42 {strides = array<i32>} : memref<1x8x8xf32, #tpu.memory_space<vmem>>, vector<1x8x8xf32>,
    return
  }
  func.func @transform_0(%arg0: i32, %arg1: i32) -> i32 {
    %c0_i32 = arith.constant 0 : i32
    %c0_i32_0 = arith.constant 0 : i32
    return %c0_i32 : i32
  }
  func.func @transform_1(%arg0: i32, %arg1: i32) -> i32 {
    %c0_i32 = arith.constant 0 : i32
    %c0_i32_0 = arith.constant 0 : i32
    return %c0_i32 : i32
  }
  func.func @transform_2(%arg0: i32, %arg1: i32) -> (i32, i32) {
    %c0_i32 = arith.constant 0 : i32
    %c0_i32_0 = arith.constant 0 : i32
    return %arg1, %c0_i32 : i32, i32
  }
  func.func @transform_3(%arg0: i32, %arg1: i32) -> (i32, i32) {
    %c0_i32 = arith.constant 0 : i32
    %c0_i32_0 = arith.constant 0 : i32
    %c0_i32_1 = arith.constant 0 : i32
    return %c0_i32, %c0_i32_0 : i32, i32
  }
  func.func @transform_4(%arg0: i32, %arg1: i32) -> (i32, i32, i32) {
    %c0_i32 = arith.constant 0 : i32
    %c0_i32_0 = arith.constant 0 : i32
    return %arg0, %arg1, %c0_i32 : i32, i32, i32
  }
}

module attributes {stable_mosaic.version = 11 : i64} {
  func.func @_posterior_kernel(%arg0: i32, %arg1: i32, %arg2: memref<1x8x8xf32, #tpu.memory_space<vmem>>, %arg3: memref<1x8x8xf32, #tpu.memory_space<vmem>>, %arg4: memref<1x1x8xf32, #tpu.memory_space<vmem>>, %arg5: memref<1x8x1xf32, #tpu.memory_space<vmem>>, %arg6: memref<1x8x8xf32, #tpu.memory_space<vmem>>) attributes {dimension_semantics = [#tpu.dimension_semantics<parallel>, #tpu.dimension_semantics<parallel>], iteration_bounds = array<i64: 2, 1>, scalar_prefetch = 0 : i64, scratch_operands = 0 : i64, tpu.core_type = #tpu.core_type<tc>, window_params = [{transform_indices = @transform_0, window_bounds = array<i64: 1, 8, 8>}, {transform_indices = @transform_1, window_bounds = array<i64: 1, 8, 8>}, {transform_indices = @transform_2, window_bounds = array<i64: 1, 1, 8>}, {transform_indices = @transform_3, window_bounds = array<i64: 1, 8, 1>}, {transform_indices = @transform_4, window_bounds = array<i64: 1, 8, 8>}]} {
    %c8_i32 = arith.constant 8 : i32
    %0 = arith.muli %arg1, %c8_i32 : i32
    %1 = tpu.assume_multiple %0, 8 : i32
    %c0 = arith.constant 0 : index
    %c0_0 = arith.constant 0 : index
    %c0_1 = arith.constant 0 : index
    %2 = vector.load %arg2[%c0, %c0_0, %c0_1] : memref<1x8x8xf32, #tpu.memory_space<vmem>>, vector<1x8x8xf32>
    %3 = vector.shape_cast %2 : vector<1x8x8xf32> to vector<8x8xf32>
    %c0_2 = arith.constant 0 : index
    %c0_3 = arith.constant 0 : index
    %c0_4 = arith.constant 0 : index
    %4 = vector.load %arg3[%c0_2, %c0_3, %c0_4] : memref<1x8x8xf32, #tpu.memory_space<vmem>>, vector<1x8x8xf32>
    %5 = vector.shape_cast %4 : vector<1x8x8xf32> to vector<8x8xf32>
    %c0_5 = arith.constant 0 : index
    %6 = arith.index_cast %1 : i32 to index
    %c0_6 = arith.constant 0 : index
    %7 = vector.load %arg2[%c0_5, %6, %c0_6] : memref<1x8x8xf32, #tpu.memory_space<vmem>>, vector<1x8x8xf32>
    %8 = vector.shape_cast %7 : vector<1x8x8xf32> to vector<8x8xf32>
    %c0_7 = arith.constant 0 : index
    %9 = arith.index_cast %1 : i32 to index
    %c0_8 = arith.constant 0 : index
    %10 = vector.load %arg3[%c0_7, %9, %c0_8] : memref<1x8x8xf32, #tpu.memory_space<vmem>>, vector<1x8x8xf32>
    %11 = vector.shape_cast %10 : vector<1x8x8xf32> to vector<8x8xf32>
    %c0_9 = arith.constant 0 : index
    %c0_10 = arith.constant 0 : index
    %c0_11 = arith.constant 0 : index
    %12 = vector.load %arg4[%c0_9, %c0_10, %c0_11] : memref<1x1x8xf32, #tpu.memory_space<vmem>>, vector<1x1x8xf32>
    %13 = vector.shape_cast %12 : vector<1x1x8xf32> to vector<1x8xf32>
    %cst = arith.constant dense<0.000000e+00> : vector<8x8xf32>
    %14 = tpu.matmul %8, %5, %cst {dimension_numbers = #tpu.dot_dimension_numbers<[1], [0], [0], [1], [0, 0, 1, 1], [], []>} : vector<8x8xf32>, vector<8x8xf32>, vector<8x8xf32> -> vector<8x8xf32>
    %cst_12 = arith.constant 1.000000e-03 : f32
    %15 = vector.broadcast %cst_12 : f32 to vector<8x8xf32>
    %16 = arith.mulf %15, %11 : vector<8x8xf32>
    %17 = arith.subf %14, %16 : vector<8x8xf32>
    %cst_13 = arith.constant dense<0.000000e+00> : vector<8x8xf32>
    %18 = tpu.matmul %17, %3, %cst_13 {dimension_numbers = #tpu.dot_dimension_numbers<[1], [0], [0], [1], [0, 0, 1, 1], [], []>} : vector<8x8xf32>, vector<8x8xf32>, vector<8x8xf32> -> vector<8x8xf32>
    %19 = arith.subf %8, %18 : vector<8x8xf32>
    %cst_14 = arith.constant 1.000000e-03 : f32
    %20 = vector.broadcast %cst_14 : f32 to vector<8x8xf32>
    %21 = arith.mulf %20, %17 : vector<8x8xf32>
    %22 = arith.addf %19, %21 : vector<8x8xf32>
    %c0_15 = arith.constant 0 : index
    %c0_16 = arith.constant 0 : index
    %c0_17 = arith.constant 0 : index
    %23 = vector.load %arg6[%c0_15, %c0_16, %c0_17] : memref<1x8x8xf32, #tpu.memory_space<vmem>>, vector<1x8x8xf32>
    %24 = vector.shape_cast %23 : vector<1x8x8xf32> to vector<8x8xf32>
    %25 = vector.shape_cast %22 : vector<8x8xf32> to vector<1x8x8xf32>
    tpu.vector_store %arg6[%c0_15, %c0_16, %c0_17], %25 {strides = array<i32>} : memref<1x8x8xf32, #tpu.memory_space<vmem>>, vector<1x8x8xf32>,
    %26 = vector.broadcast %13 : vector<1x8xf32> to vector<8x8xf32>
    %27 = arith.mulf %17, %26 : vector<8x8xf32>
    %cst_18 = arith.constant dense<0.000000e+00> : vector<8xf32>
    %28 = vector.multi_reduction <add>, %27, %cst_18 [1] : vector<8x8xf32> to vector<8xf32>
    %29 = vector.shape_cast %28 : vector<8xf32> to vector<8x1xf32>
    %c0_19 = arith.constant 0 : index
    %c0_20 = arith.constant 0 : index
    %c0_21 = arith.constant 0 : index
    %30 = vector.load %arg5[%c0_19, %c0_20, %c0_21] : memref<1x8x1xf32, #tpu.memory_space<vmem>>, vector<1x8x1xf32>
    %31 = vector.shape_cast %30 : vector<1x8x1xf32> to vector<8x1xf32>
    %32 = vector.shape_cast %29 : vector<8x1xf32> to vector<1x8x1xf32>
    tpu.vector_store %arg5[%c0_19, %c0_20, %c0_21], %32 {strides = array<i32>} : memref<1x8x1xf32, #tpu.memory_space<vmem>>, vector<1x8x1xf32>,
    return
  }
  func.func @transform_0(%arg0: i32, %arg1: i32) -> (i32, i32, i32) {
    %c0_i32 = arith.constant 0 : i32
    %c0_i32_0 = arith.constant 0 : i32
    %c0_i32_1 = arith.constant 0 : i32
    return %arg0, %c0_i32, %c0_i32_0 : i32, i32, i32
  }
  func.func @transform_1(%arg0: i32, %arg1: i32) -> (i32, i32, i32) {
    %c0_i32 = arith.constant 0 : i32
    %c0_i32_0 = arith.constant 0 : i32
    %c0_i32_1 = arith.constant 0 : i32
    return %arg0, %c0_i32, %c0_i32_0 : i32, i32, i32
  }
  func.func @transform_2(%arg0: i32, %arg1: i32) -> (i32, i32, i32) {
    %c0_i32 = arith.constant 0 : i32
    %c0_i32_0 = arith.constant 0 : i32
    %c0_i32_1 = arith.constant 0 : i32
    return %arg0, %c0_i32, %c0_i32_0 : i32, i32, i32
  }
  func.func @transform_3(%arg0: i32, %arg1: i32) -> (i32, i32, i32) {
    %c0_i32 = arith.constant 0 : i32
    %c0_i32_0 = arith.constant 0 : i32
    return %arg0, %arg1, %c0_i32 : i32, i32, i32
  }
  func.func @transform_4(%arg0: i32, %arg1: i32) -> (i32, i32, i32) {
    %c0_i32 = arith.constant 0 : i32
    %c0_i32_0 = arith.constant 0 : i32
    return %arg0, %arg1, %c0_i32 : i32, i32, i32
  }
}

</mosaic_0001>

<bundles_post_ra>
// kernel: custom-call.6
= control target key start
LH: loop header
LB: loop body
LE: loop exit
PB: predicated region body
PF: predicated region fallthrough
CT: control target
= control target key end

     0   :  { %s469_s6 = smov 0   ;;  %s471_s7 = smov 0   ;;  %s549_s0 = inlined_call_operand.vmem [shape: f32[2,8,8], index: 0, kind: input, shape index: {}]   ;;  %s550_s1 = inlined_call_operand.vmem [shape: f32[2,8,8], index: 1, kind: output, shape index: {}]  }
   0x1   :  { %s473_s8 = smov 0  }
   0x2 LB: > { %s367_s9 = sadd.s32 4294967295, %s456_s8   ;;  %s26_s10 = sadd.s32 1, %s452_s7  ;;  %s456_s8 = sphi %s473_s8, %s7_s8   ;;  %s452_s7 = sphi %s471_s7, %s552_s7   ;;  %s448_s6 = sphi %s469_s6, %s551_s6  }
   0x3   : > { %p28_p0 = scmp.ge.s32.totalorder %s26_s10, 2  ;;  %p369_p1 = scmp.ge.s32.totalorder %s456_s8, 2 }
   0x4   : > { %s42_s11 = sand.u32 (!%p369_p1), 1, %s456_s8   ;;  %s371_s12 = sshll.u32 (!%p369_p1), %s452_s7, 3 }
   0x5   : > { %s554_s10 = smov (%p28_p0, %s26_s10), 0  ;;  %40 = sbr.rel (%p369_p1) target bundleno = 12 (0xc), region = 16 }
   0x6   : > { %s370_s13 = sshll.u32 (!%p369_p1), %s42_s11, 3  ;;  %s48_s16 = scalar_lea.vmem (!%p369_p1), %s549_s0, %s371_s12 }
   0x7   : > { %v76_v0 = vld [vmem:[%s48_s16] sm:$0xff] (!%p369_p1)  ;;  %s44_s17 = scalar_lea.vmem (!%p369_p1), [#allocation0], %s370_s13 }
   0x8   : > { %77 = vst [vmem:[%s44_s17] sm:$0xff] (!%p369_p1), %v76_v0 }
   0xc PF: > { %p372_p2 = scmp.ge.s32.totalorder %s456_s8, 1  ;;  %p82_p3 = scmp.lt.s32.totalorder %s456_s8, 3 }
   0xe   : > { %p83_p4 = pnand %p372_p2, %p82_p3 }
   0xf   : > { %s89_s18 = sand.u32 (!%p83_p4), 1, %s367_s9   ;;  %v458_v1 = vmov (!%p83_p4), 0.0   ;;  %vm101_vm0 = vcmask (!%p83_p4), 7168   ;;  %vm119_vm1 = vcmask (!%p83_p4), 15368   ;;  %vm136_vm2 = vcmask (!%p83_p4), 1047553   ;;  %s390_s22 = sshll.u32 (!%p83_p4), %s448_s6, 3 }
  0x10   : > { %86 = sbr.rel (%p83_p4) target bundleno = 1377 (0x561), region = 54  ;;  %s373_s19 = sshll.u32 (!%p83_p4), %s89_s18, 3  ;;  %vm137_vm3 = vmand (!%p83_p4), %vm119_vm1, %vm136_vm2  ;;  %vm141_vm4 = vcmask (!%p83_p4), 23568   ;;  %vm158_vm5 = vcmask (!%p83_p4), 1047554   ;;  %vm163_vm7 = vcmask (!%p83_p4), 31768   ;;  %vm180_vm8 = vcmask (!%p83_p4), 1047555  }
  0x11   : > { %s496_s20 = scalar_lea.vmem (!%p83_p4), [#allocation1], %s373_s19  ;;  %s500_s21 = scalar_lea.vmem (!%p83_p4), [#allocation0], %s373_s19  ;;  %vm159_vm6 = vmand (!%p83_p4), %vm141_vm4, %vm158_vm5  ;;  %vm185_vm10 = vcmask (!%p83_p4), 39968   ;;  %vm202_vm11 = vcmask (!%p83_p4), 1047556   ;;  %vm207_vm13 = vcmask (!%p83_p4), 48168   ;;  %vm224_vm14 = vcmask (!%p83_p4), 1047557  }
  0x12   : > { %100 = vst [vmem:[%s496_s20] sm:$0xff] (!%p83_p4), %v458_v1  ;;  %v103_v5 = vld [vmem:[%s500_s21] ss:$0 sm:$0xff] (!%p83_p4)  ;;  %v376_v17 = vld [vmem:[%s500_s21 + $0x1] ss:$0 sm:$0xff] (!%p83_p4)  ;;  %v378_v29 = vld [vmem:[%s500_s21 + $0x2] ss:$0 sm:$0xff] (!%p83_p4)  ;;  %s280_s25 = scalar_lea.vmem (!%p83_p4), %s550_s1, %s390_s22 }
  0x13   : > { %v504_v9 = vld [vmem:[%s500_s21] sm:$0xff] (!%p83_p4)  ;;  %vm181_vm9 = vmand (!%p83_p4), %vm163_vm7, %vm180_vm8  ;;  %vm246_vm1 = vcmask (!%p83_p4), 1047558   ;;  %vm268_vm4 = vcmask (!%p83_p4), 1047559  }
  0x14   : > { %v380_v41 = vld [vmem:[%s500_s21 + $0x3] ss:$0 sm:$0xff] (!%p83_p4)  ;;  %v382_v53 = vld [vmem:[%s500_s21 + $0x4] ss:$0 sm:$0xff] (!%p83_p4)  ;;  %vm203_vm12 = vmand (!%p83_p4), %vm185_vm10, %vm202_vm11 }
  0x15   : > { %v384_v1 = vld [vmem:[%s500_s21 + $0x5] ss:$0 sm:$0xff] (!%p83_p4)  ;;  %vm225_vm15 = vmand (!%p83_p4), %vm207_vm13, %vm224_vm14 }
  0x19   : > { %v102_v2 = vld [vmem:[%s496_s20] ss:$0 sm:$0xff] }
  0x1a   : > { %v104_v3 = vmul.f32 %v102_v2, %v102_v2  ;;  %v111_v4 = vmul.f32 0.0, %v102_v2 }
  0x1c   : > { %105 = vadd.xlane.f32.xlu0 %v104_v3 }
  0x20   : > { %112 = vadd.xlane.f32.xlu0 %v111_v4 }
  0xa9   : > { %v106_v6 = vpop.xlane.xlu0 %105 }
  0xaa   : > { %v107_v7 = vsub.f32 %v103_v5, %v106_v6 }
  0xac   : > { %418 = vrsqrt.f32 %v107_v7 }
  0xad   : > { %v113_v8 = vpop.xlane.xlu0 %112 }
  0xae   : > { %v114_v10 = vsub.f32 %v504_v9, %v113_v8 }
  0xb6   : > { %v419_v11 = vpop.eup %418 }
  0xb7   : > { %v115_v12 = vmul.f32 %v419_v11, %v114_v10 }
  0xb9   : > { %v116_v13 = vsel %vm101_vm0, %v115_v12, 0.0  ;;  %vm229_vm0 = vcmask 56368  }
  0xba   : > { %118 = vst [vmem:[%s496_s20] sm:$0xff] %v116_v13  ;;  %vm247_vm2 = vmand %vm229_vm0, %vm246_vm1 }
  0xc1   : > { %v375_v14 = vld [vmem:[%s496_s20 + $0x1] ss:$0 sm:$0xff] }
  0xc2   : > { %v124_v15 = vmul.f32 %v375_v14, %v375_v14  ;;  %v131_v16 = vmul.f32 %v375_v14, %v116_v13  ;;  %v386_v14 = vld [vmem:[%s500_s21 + $0x6] ss:$0 sm:$0xff] }
  0xc4   : > { %125 = vadd.xlane.f32.xlu1 %v124_v15 }
  0xc8   : > { %132 = vadd.xlane.f32.xlu1 %v131_v16 }
 0x151   : > { %v126_v18 = vpop.xlane.xlu1 %125 }
 0x152   : > { %v127_v19 = vsub.f32 %v376_v17, %v126_v18 }
 0x154   : > { %420 = vrsqrt.f32 %v127_v19 }
 0x155   : > { %v133_v20 = vpop.xlane.xlu1 %132 }
 0x156   : > { %v134_v21 = vsub.f32 %v504_v9, %v133_v20 }
 0x15e   : > { %v421_v22 = vpop.eup %420 }
 0x15f   : > { %v135_v23 = vmul.f32 %v421_v22, %v134_v21 }
 0x161   : > { %v138_v24 = vsel %vm137_vm3, %v135_v23, 0.0  ;;  %vm251_vm3 = vcmask 64568  }
 0x162   : > { %v139_v25 = vadd.f32 %v138_v24, %v116_v13  ;;  %vm269_vm5 = vmand %vm251_vm3, %vm268_vm4 }
 0x164   : > { %140 = vst [vmem:[%s496_s20] sm:$0xff] %v139_v25 }
 0x16b   : > { %v377_v26 = vld [vmem:[%s496_s20 + $0x2] ss:$0 sm:$0xff] }
 0x16c   : > { %v153_v27 = vmul.f32 %v377_v26, %v139_v25  ;;  %v146_v28 = vmul.f32 %v377_v26, %v377_v26  ;;  %v388_v26 = vld [vmem:[%s500_s21 + $0x7] ss:$0 sm:$0xff] }
 0x16e   : > { %154 = vadd.xlane.f32.xlu1 %v153_v27  ;;  %147 = vadd.xlane.f32.xlu0 %v146_v28 }
 0x1fb   : > { %v148_v30 = vpop.xlane.xlu0 %147  ;;  %v155_v32 = vpop.xlane.xlu1 %154 }
 0x1fc   : > { %v149_v31 = vsub.f32 %v378_v29, %v148_v30  ;;  %v156_v33 = vsub.f32 %v504_v9, %v155_v32 }
 0x1fe   : > { %422 = vrsqrt.f32 %v149_v31 }
 0x208   : > { %v423_v34 = vpop.eup %422 }
 0x209   : > { %v157_v35 = vmul.f32 %v423_v34, %v156_v33 }
 0x20b   : > { %v160_v36 = vsel %vm159_vm6, %v157_v35, 0.0 }
 0x20c   : > { %v161_v37 = vadd.f32 %v160_v36, %v139_v25 }
 0x20e   : > { %162 = vst [vmem:[%s496_s20] sm:$0xff] %v161_v37 }
 0x215   : > { %v379_v38 = vld [vmem:[%s496_s20 + $0x3] ss:$0 sm:$0xff] }
 0x216   : > { %v175_v39 = vmul.f32 %v379_v38, %v161_v37  ;;  %v168_v40 = vmul.f32 %v379_v38, %v379_v38 }
 0x218   : > { %176 = vadd.xlane.f32.xlu1 %v175_v39  ;;  %169 = vadd.xlane.f32.xlu0 %v168_v40 }
 0x2a5   : > { %v170_v42 = vpop.xlane.xlu0 %169  ;;  %v177_v44 = vpop.xlane.xlu1 %176 }
 0x2a6   : > { %v171_v43 = vsub.f32 %v380_v41, %v170_v42  ;;  %v178_v45 = vsub.f32 %v504_v9, %v177_v44 }
 0x2a8   : > { %424 = vrsqrt.f32 %v171_v43 }
 0x2b2   : > { %v425_v46 = vpop.eup %424 }
 0x2b3   : > { %v179_v47 = vmul.f32 %v425_v46, %v178_v45 }
 0x2b5   : > { %v182_v48 = vsel %vm181_vm9, %v179_v47, 0.0 }
 0x2b6   : > { %v183_v49 = vadd.f32 %v182_v48, %v161_v37 }
 0x2b8   : > { %184 = vst [vmem:[%s496_s20] sm:$0xff] %v183_v49 }
 0x2bf   : > { %v381_v50 = vld [vmem:[%s496_s20 + $0x4] ss:$0 sm:$0xff] }
 0x2c0   : > { %v197_v51 = vmul.f32 %v381_v50, %v183_v49  ;;  %v190_v52 = vmul.f32 %v381_v50, %v381_v50 }
 0x2c2   : > { %198 = vadd.xlane.f32.xlu1 %v197_v51  ;;  %191 = vadd.xlane.f32.xlu0 %v190_v52 }
 0x34f   : > { %v192_v54 = vpop.xlane.xlu0 %191  ;;  %v199_v56 = vpop.xlane.xlu1 %198 }
 0x350   : > { %v193_v55 = vsub.f32 %v382_v53, %v192_v54  ;;  %v200_v57 = vsub.f32 %v504_v9, %v199_v56 }
 0x352   : > { %426 = vrsqrt.f32 %v193_v55 }
 0x35c   : > { %v427_v58 = vpop.eup %426 }
 0x35d   : > { %v201_v59 = vmul.f32 %v427_v58, %v200_v57 }
 0x35f   : > { %v204_v60 = vsel %vm203_vm12, %v201_v59, 0.0 }
 0x360   : > { %v205_v61 = vadd.f32 %v204_v60, %v183_v49 }
 0x362   : > { %206 = vst [vmem:[%s496_s20] sm:$0xff] %v205_v61 }
 0x369   : > { %v383_v62 = vld [vmem:[%s496_s20 + $0x5] ss:$0 sm:$0xff] }
 0x36a   : > { %v219_v63 = vmul.f32 %v383_v62, %v205_v61  ;;  %v212_v0 = vmul.f32 %v383_v62, %v383_v62 }
 0x36c   : > { %220 = vadd.xlane.f32.xlu1 %v219_v63  ;;  %213 = vadd.xlane.f32.xlu0 %v212_v0 }
 0x3f9   : > { %v214_v2 = vpop.xlane.xlu0 %213  ;;  %v221_v4 = vpop.xlane.xlu1 %220 }
 0x3fa   : > { %v215_v3 = vsub.f32 %v384_v1, %v214_v2  ;;  %v222_v5 = vsub.f32 %v504_v9, %v221_v4 }
 0x3fc   : > { %428 = vrsqrt.f32 %v215_v3 }
 0x406   : > { %v429_v6 = vpop.eup %428 }
 0x407   : > { %v223_v7 = vmul.f32 %v429_v6, %v222_v5 }
 0x409   : > { %v226_v8 = vsel %vm225_vm15, %v223_v7, 0.0 }
 0x40a   : > { %v227_v10 = vadd.f32 %v226_v8, %v205_v61 }
 0x40c   : > { %228 = vst [vmem:[%s496_s20] sm:$0xff] %v227_v10 }
 0x413   : > { %v385_v11 = vld [vmem:[%s496_s20 + $0x6] ss:$0 sm:$0xff] }
 0x414   : > { %v241_v12 = vmul.f32 %v385_v11, %v227_v10  ;;  %v234_v13 = vmul.f32 %v385_v11, %v385_v11 }
 0x416   : > { %242 = vadd.xlane.f32.xlu1 %v241_v12  ;;  %235 = vadd.xlane.f32.xlu0 %v234_v13 }
 0x4a3   : > { %v236_v15 = vpop.xlane.xlu0 %235  ;;  %v243_v17 = vpop.xlane.xlu1 %242 }
 0x4a4   : > { %v237_v16 = vsub.f32 %v386_v14, %v236_v15  ;;  %v244_v18 = vsub.f32 %v504_v9, %v243_v17 }
 0x4a6   : > { %430 = vrsqrt.f32 %v237_v16 }
 0x4b0   : > { %v431_v19 = vpop.eup %430 }
 0x4b1   : > { %v245_v20 = vmul.f32 %v431_v19, %v244_v18 }
 0x4b3   : > { %v248_v21 = vsel %vm247_vm2, %v245_v20, 0.0 }
 0x4b4   : > { %v249_v22 = vadd.f32 %v248_v21, %v227_v10 }
 0x4b6   : > { %250 = vst [vmem:[%s496_s20] sm:$0xff] %v249_v22 }
 0x4bd   : > { %v387_v23 = vld [vmem:[%s496_s20 + $0x7] ss:$0 sm:$0xff] }
 0x4be   : > { %v263_v24 = vmul.f32 %v387_v23, %v249_v22  ;;  %v256_v25 = vmul.f32 %v387_v23, %v387_v23 }
 0x4c0   : > { %264 = vadd.xlane.f32.xlu1 %v263_v24  ;;  %257 = vadd.xlane.f32.xlu0 %v256_v25 }
 0x54d   : > { %v258_v27 = vpop.xlane.xlu0 %257  ;;  %v265_v29 = vpop.xlane.xlu1 %264 }
 0x54e   : > { %v259_v28 = vsub.f32 %v388_v26, %v258_v27  ;;  %v266_v30 = vsub.f32 %v504_v9, %v265_v29 }
 0x550   : > { %432 = vrsqrt.f32 %v259_v28 }
 0x55a   : > { %v433_v31 = vpop.eup %432 }
 0x55b   : > { %v267_v32 = vmul.f32 %v433_v31, %v266_v30 }
 0x55d   : > { %v270_v33 = vsel %vm269_vm5, %v267_v32, 0.0 }
 0x55e   : > { %v271_v34 = vadd.f32 %v270_v33, %v249_v22 }
 0x560   : > { %272 = vst [vmem:[%s496_s20] sm:$0xff] %v271_v34  ;;  %309 = vst [vmem:[%s280_s25] sm:$0xff] %v271_v34 }
 0x561 PF: > { %s7_s8 = sadd.s32 1, %s456_s8   ;;  %s551_s6 = smov %s452_s7 }
 0x562   : > { %p4_p5 = scmp.ge.s32.totalorder %s7_s8, 4   ;;  %s552_s7 = smov %s554_s10 }
 0x564   :  { %6 = sbr.rel (!%p4_p5) target bundleno = 2 (0x2), region = 132 }

// kernel: custom-call.7
= control target key start
LH: loop header
LB: loop body
LE: loop exit
PB: predicated region body
PF: predicated region fallthrough
CT: control target
= control target key end

     0   :  { %s385_s6 = smov 0   ;;  %s387_s7 = smov 0   ;;  %s443_s0 = inlined_call_operand.vmem [shape: f32[2,1,8,8], index: 0, kind: input, shape index: {}]   ;;  %s444_s1 = inlined_call_operand.vmem [shape: f32[2,1,8,8], index: 1, kind: output, shape index: {}]  }
   0x1   :  { %s389_s8 = smov 0  }
   0x2 LB: > { %s311_s9 = sadd.s32 4294967295, %s372_s8   ;;  %s33_s10 = sadd.s32 1, %s368_s7  ;;  %s372_s8 = sphi %s389_s8, %s7_s8   ;;  %s368_s7 = sphi %s387_s7, %s446_s7   ;;  %s364_s6 = sphi %s385_s6, %s445_s6  }
   0x3   : > { %p35_p0 = scmp.ge.s32.totalorder %s33_s10, 2  ;;  %p313_p1 = scmp.ge.s32.totalorder %s372_s8, 2 }
   0x4   : > { %s49_s11 = sand.u32 (!%p313_p1), 1, %s372_s8   ;;  %s315_s12 = sshll.u32 (!%p313_p1), %s368_s7, 3 }
   0x5   : > { %s448_s10 = smov (%p35_p0, %s33_s10), 0  ;;  %47 = sbr.rel (%p313_p1) target bundleno = 12 (0xc), region = 16 }
   0x6   : > { %s314_s13 = sshll.u32 (!%p313_p1), %s49_s11, 3  ;;  %s56_s16 = scalar_lea.vmem (!%p313_p1), %s443_s0, %s315_s12 }
   0x7   : > { %v84_v0 = vld [vmem:[%s56_s16] sm:$0xff] (!%p313_p1)  ;;  %s51_s17 = scalar_lea.vmem (!%p313_p1), [#allocation0], %s314_s13 }
   0x8   : > { %85 = vst [vmem:[%s51_s17] sm:$0xff] (!%p313_p1), %v84_v0 }
   0xc PF: > { %p316_p2 = scmp.ge.s32.totalorder %s372_s8, 1  ;;  %p90_p3 = scmp.lt.s32.totalorder %s372_s8, 3 }
   0xe   : > { %p91_p4 = pnand %p316_p2, %p90_p3 }
  0x10   : > { %94 = sbr.rel (%p91_p4) target bundleno = 1213 (0x4bd), region = 54 }
  0x17   : > { %s97_s18 = sand.u32 1, %s311_s9   ;;  %v108_v1 = vlaneseq  ;;  %v374_v10 = vmov -1.0   ;;  %s320_s21 = sshll.u32 %s364_s6, 3 }
  0x18   : > { %s317_s19 = sshll.u32 %s97_s18, 3  ;;  %s219_s24 = scalar_lea.vmem %s444_s1, %s320_s21 }
  0x19   : > { %v412_v2 = vand.u32 127, %v108_v1  ;;  %v112_v3 = vshrl.u32 %v108_v1, 7  ;;  %s99_s20 = scalar_lea.vmem [#allocation0], %s317_s19 }
  0x1a   : > { %v115_v4 = vld [vmem:[%s99_s20] sm:$0xff] }
  0x1b   : > { %vm110_vm0 = vcmp.lt.s32.totalorder %v412_v2, 8  ;;  %vm114_vm1 = vcmp.eq.s32.totalorder %v112_v3, %v412_v2  ;;  %vm119_vm2 = vcmp.ge.s32.totalorder %v112_v3, %v412_v2  ;;  %vm133_vm4 = vcmp.eq.s32.totalorder %v412_v2, 0 }
  0x1c   : > { %v116_v5 = vsel %vm114_vm1, %v115_v4, 0.0  ;;  %vm120_vm3 = vmand %vm119_vm2, %vm110_vm0  ;;  %vm130_vm5 = vcmp.eq.s32.totalorder %v412_v2, %v112_v3  ;;  %v134_v11 = vsel %vm133_vm4, 1.0, %v374_v10  ;;  %vm141_vm6 = vcmp.eq.s32.totalorder %v412_v2, 1 }
  0x1d   : > { %v121_v6 = vsel %vm120_vm3, %v115_v4, 0.0  ;;  %117 = vadd.xlane.f32.xlu0 %v116_v5  ;;  %v135_v12 = vsel %vm130_vm5, %v134_v11, 0.0  ;;  %vm151_vm7 = vcmp.eq.s32.totalorder %v412_v2, 2  ;;  %vm161_vm8 = vcmp.eq.s32.totalorder %v412_v2, 3 }
  0x1e   : > { %vm171_vm9 = vcmp.eq.s32.totalorder %v412_v2, 4  ;;  %vm181_vm10 = vcmp.eq.s32.totalorder %v412_v2, 5  ;;  %vm191_vm11 = vcmp.eq.s32.totalorder %v412_v2, 6  ;;  %vm201_vm12 = vcmp.eq.s32.totalorder %v412_v2, 7 }
  0xaa   : > { %v417_v7 = vpop.xlane.xlu0 %117 }
  0xab   : > { %348 = vrcp.f32 %v417_v7  ;;  %vm208_vm13 = vweird.f32 %v417_v7 }
  0xb5   : > { %v349_v8 = vpop.eup %348 }
  0xb6   : > { %v123_v9 = vmul.f32 %v349_v8, %v121_v6 }
  0xb8   : > { %124 = vst [vmem:[#allocation2] sm:$0xff] %v123_v9 }
  0xbf   : > { %v137_v13 = vld [vmem:[#allocation2 + $0x1] ss:$0 sm:$0xff]  ;;  %v147_v16 = vld [vmem:[#allocation2 + $0x2] ss:$0 sm:$0xff]  ;;  %v157_v21 = vld [vmem:[#allocation2 + $0x3] ss:$0 sm:$0xff] }
  0xc0   : > { %v138_v14 = vxor.u32 2147483648, %v137_v13  ;;  %v148_v18 = vxor.u32 2147483648, %v147_v16  ;;  %v158_v23 = vxor.u32 2147483648, %v157_v21  ;;  %v167_v26 = vld [vmem:[#allocation2 + $0x4] ss:$0 sm:$0xff] }
  0xc1   : > { %v168_v28 = vxor.u32 2147483648, %v167_v26  ;;  %v177_v31 = vld [vmem:[#allocation2 + $0x5] ss:$0 sm:$0xff]  ;;  %v187_v36 = vld [vmem:[#allocation2 + $0x6] ss:$0 sm:$0xff] }
  0xc2   : > { %v142_v15 = vmul.f32 %v138_v14, %v135_v12  ;;  %v178_v33 = vxor.u32 2147483648, %v177_v31  ;;  %v188_v38 = vxor.u32 2147483648, %v187_v36  ;;  %v197_v41 = vld [vmem:[#allocation2 + $0x7] ss:$0 sm:$0xff] }
  0xc3   : > { %v198_v43 = vxor.u32 2147483648, %v197_v41 }
  0xc4   : > { %143 = vadd.xlane.f32.xlu0 %v142_v15 }
 0x151   : > { %v144_v17 = vpop.xlane.xlu0 %143 }
 0x152   : > { %v145_v19 = vsel %vm141_vm6, %v144_v17, %v135_v12 }
 0x153   : > { %v152_v20 = vmul.f32 %v148_v18, %v145_v19 }
 0x155   : > { %153 = vadd.xlane.f32.xlu1 %v152_v20 }
 0x1e2   : > { %v154_v22 = vpop.xlane.xlu1 %153 }
 0x1e3   : > { %v155_v24 = vsel %vm151_vm7, %v154_v22, %v145_v19 }
 0x1e4   : > { %v162_v25 = vmul.f32 %v158_v23, %v155_v24 }
 0x1e6   : > { %163 = vadd.xlane.f32.xlu1 %v162_v25 }
 0x273   : > { %v164_v27 = vpop.xlane.xlu1 %163 }
 0x274   : > { %v165_v29 = vsel %vm161_vm8, %v164_v27, %v155_v24 }
 0x275   : > { %v172_v30 = vmul.f32 %v168_v28, %v165_v29 }
 0x277   : > { %173 = vadd.xlane.f32.xlu0 %v172_v30 }
 0x304   : > { %v174_v32 = vpop.xlane.xlu0 %173 }
 0x305   : > { %v175_v34 = vsel %vm171_vm9, %v174_v32, %v165_v29 }
 0x306   : > { %v182_v35 = vmul.f32 %v178_v33, %v175_v34 }
 0x308   : > { %183 = vadd.xlane.f32.xlu1 %v182_v35 }
 0x395   : > { %v184_v37 = vpop.xlane.xlu1 %183 }
 0x396   : > { %v185_v39 = vsel %vm181_vm10, %v184_v37, %v175_v34 }
 0x397   : > { %v192_v40 = vmul.f32 %v188_v38, %v185_v39 }
 0x399   : > { %193 = vadd.xlane.f32.xlu0 %v192_v40 }
 0x426   : > { %v194_v42 = vpop.xlane.xlu0 %193 }
 0x427   : > { %v195_v44 = vsel %vm191_vm11, %v194_v42, %v185_v39 }
 0x428   : > { %v202_v45 = vmul.f32 %v198_v43, %v195_v44 }
 0x42a   : > { %203 = vadd.xlane.f32.xlu1 %v202_v45 }
 0x4b7   : > { %v204_v46 = vpop.xlane.xlu1 %203 }
 0x4b8   : > { %v205_v47 = vsel %vm201_vm12, %v204_v46, %v195_v44 }
 0x4b9   : > { %v207_v48 = vmul.f32 %v349_v8, %v205_v47 }
 0x4bb   : > { %v209_v49 = vsel %vm208_vm13, %v205_v47, %v207_v48 }
 0x4bc   : > { %248 = vst [vmem:[%s219_s24] sm:$0xff] %v209_v49 }
 0x4bd PF: > { %s7_s8 = sadd.s32 1, %s372_s8   ;;  %s445_s6 = smov %s368_s7 }
 0x4be   : > { %p4_p5 = scmp.ge.s32.totalorder %s7_s8, 4   ;;  %s446_s7 = smov %s448_s10 }
 0x4c0   :  { %6 = sbr.rel (!%p4_p5) target bundleno = 2 (0x2), region = 125 }

// kernel: gpr_forward.3
= control target key start
LH: loop header
LB: loop body
LE: loop exit
PB: predicated region body
PF: predicated region fallthrough
CT: control target
= control target key end

     0   :  { %10 = vsyncpa [#allocation3], 0  ;;  %s899_s0 = inlined_call_operand.vmem [shape: f32[2,8,8], index: 0, kind: input, shape index: {}]   ;;  %s900_s1 = inlined_call_operand.vmem [shape: f32[2,8,8], index: 1, kind: input, shape index: {}]   ;;  %s901_s2 = inlined_call_operand.vmem [shape: f32[2,1,8], index: 2, kind: input, shape index: {}]   ;;  %s902_s3 = inlined_call_operand.vmem [shape: f32[2,8,1], index: 3, kind: output, shape index: {0}]   ;;  %s903_s4 = inlined_call_operand.hbm [shape: f32[2,8,8], index: 4, kind: output, shape index: {1}]  }
   0x1   :  { %12 = vsyncpa [#allocation3 + $0x1], 0  ;;  %s774_s15 = smov 0   ;;  %s776_s16 = smov 0  }
   0x2   :  { %s778_s17 = smov 0   ;;  %s780_s18 = smov 0  }
   0x3   :  { %s782_s19 = smov 0   ;;  %s784_s20 = smov 0  }
   0x4 LB: > { %s579_s21 = sadd.s32 4294967295, %s744_s20   ;;  %s580_s22 = sadd.s32 4294967294, %s744_s20   ;;  %s744_s20 = sphi %s784_s20, %s18_s20   ;;  %s740_s19 = sphi %s782_s19, %s910_s19   ;;  %s736_s18 = sphi %s780_s18, %s909_s18   ;;  %s732_s17 = sphi %s778_s17, %s908_s17   ;;  %s728_s16 = sphi %s776_s16, %s907_s16   ;;  %s724_s15 = sphi %s774_s15, %s906_s15  }
   0x5   : > { %s30_s23 = sadd.s32 1, %s740_s19  ;;  %s145_s24 = sadd.s32 1, %s732_s17 }
   0x6   : > { %p32_p0 = scmp.ge.s32.totalorder %s30_s23, 2  ;;  %p155_p1 = scmp.ne.s32.totalorder %s732_s17, %s728_s16 }
   0x7   : > { %p156_p2 = scmp.eq.s32.totalorder %s579_s21, 1  ;;  %p161_p3 = scmp.ne.s32.totalorder %s728_s16, %s724_s15 }
   0x8   : > { %s912_s23 = smov (%p32_p0, %s30_s23), 0  ;;  %p162_p5 = scmp.eq.s32.totalorder %s580_s22, 1 }
   0x9   : > { %p814_p4 = por %p156_p2, %p155_p1  ;;  %s140_s26 = ssub.s32 %s740_s19, %s912_s23 }
   0xa   : > { %p583_p6 = scmp.ge.s32.totalorder %s744_s20, 1  ;;  %p143_p7 = scmp.eq.s32.totalorder %s140_s26, 0 }
   0xb   : > { %p821_p8 = por %p162_p5, %p161_p3  ;;  %p200_p9 = scmp.lt.s32.totalorder %s744_s20, 3 }
   0xc   : > { %s827_s28 = scalar_select %p143_p7, %s732_s17, %s145_s24  }
   0xd   : > { %p201_p10 = pnand %p583_p6, %p200_p9 }
   0xe   : > { %p239_p11 = scmp.lt.s32.totalorder (!%p201_p10), %s736_s18, 1  ;;  %v746_v0 = vmov (!%p201_p10), 0.0   ;;  %vm747_vm0 = vmmov (!%p201_p10), 0   ;;  %vm265_vm1 = vcmask (!%p201_p10), 64512   ;;  %vm428_vm2 = vcmask (!%p201_p10), 7168   ;;  %s236_s24 = sand.u32 (!%p201_p10), 1, %s728_s16  }
   0xf   : > { %204 = sbr.rel (%p201_p10) target bundleno = 472 (0x1d8), region = 32  ;;  %599 = vmatprep.subr.mxu0 (!%p201_p10), %v746_v0  ;;  %601 = vmatprep.mubr.msk.f32.mxu0 (!%p201_p10), %vm747_vm0, %v746_v0  ;;  %s584_s26 = sshll.u32 (!%p201_p10), %s236_s24, 3 }
  0x10   : > { %604 = vmatprep.subr.mxu1 (!%p201_p10), %v746_v0  ;;  %606 = vmatprep.mubr.msk.f32.mxu1 (!%p201_p10), %vm747_vm0, %v746_v0  ;;  %s238_s5 = scalar_lea.vmem (!%p201_p10), [#allocation2], %s584_s26 }
  0x11   : > { %s455_s6 = sshll.u32 (!%p201_p10), %s238_s5, 4  ;;  %s853_s6 = int_to_ptr.vmem [resolvable:$true] %s455_s6 }
  0x16   : > { %s240_s29 = scalar_select %p239_p11, %s736_s18, 1 }
  0x18   : > { %s585_s30 = sshll.u32 %s240_s29, 3  ;;  %s249_s13 = scalar_lea.vmem %s901_s2, %s240_s29 }
  0x19   : > { %s246_s7 = scalar_lea.vmem %s900_s1, %s585_s30  ;;  %s242_s10 = scalar_lea.vmem %s899_s0, %s585_s30  ;;  %v590_v5 = vld [vmem:[%s249_s13] ss:$0 sm:$0xff] }
  0x1a   : > { %v259_v1 = vld [vmem:[%s246_s7] sm:$0xff]  ;;  %s256_s22 = scalar_lea.vmem %s902_s3, %s585_s30  ;;  %s592_s29 = sshll.u32 %s736_s18, 7 }
  0x1b   : > { %v261_v2 = vld [vmem:[%s242_s10] sm:$0xff]  ;;  %600 = vmatpush3.msra.mxu0 %v259_v1  ;;  %v339_v3 = vmul.f32 0.001, %v259_v1  ;;  %s851_s9 = scalar_lea.hbm %s903_s4, %s592_s29  ;;  %s438_s30 = scalar_lea.sflag [#allocation3], %s236_s24 }
  0x1c   : > { %605 = vmatpush3.msra.mxu1 %v261_v2  ;;  %602 = vmatmul.mubr.msk.f32.vlgmr.msra.gmra.mrb[0].mxu0 %vm265_vm1, %v261_v2  ;;  %s666_s18 = scalar_lea.vmem %s853_s6, 128  ;;  %s748_s10 = smov [#allocation2]  }
  0x1d   : > { %p667_p12 = scmp.ne.s32.totalorder %s853_s6, %s666_s18  ;;  %s670_s11 = sshll.u32 %s748_s10, 4  ;;  %s671_s11 = int_to_ptr.vmem [resolvable:$false] %s670_s11 }
  0x1e   : > { %s672_s12 = scalar_lea.vmem %s671_s11, 256  ;;  %p673_p1 = scmp.lt.s32.totalorder %s853_s6, %s671_s11 }
  0x1f   : > { %p668_p13 = pnand %p667_p12, %p814_p4  ;;  %p674_p2 = scmp.lt.s32.totalorder %s672_s12, %s666_s18 }
  0x21   : > { %p669_p0 = pneg %p668_p13  ;;  %p675_p3 = por %p674_p2, %p673_p1 }
  0x23   : > { %p676_p5 = pnand %p675_p3, %p669_p0 }
  0xef   : > { %v335_v4 = vpop.f32.mrb[0].mxu0 }
  0xf0   : > { %v340_v6 = vsub.f32 %v335_v4, %v339_v3  ;;  %v603_v7 = vpop.f32.mrb[1].mxu0 }
  0xf2   : > { %607 = vmatmul.mubr.msk.f32.vlgmr.msra.gmra.mrb[0].mxu1 %vm265_vm1, %v340_v6  ;;  %v424_v8 = vmul.f32 %v590_v5, %v340_v6  ;;  %v415_v13 = vmul.f32 0.001, %v340_v6 }
  0xf4   : > { %v425_v9 = vsel %vm265_vm1, %v424_v8, 0.0 }
  0xf5   : > { %426 = vadd.xlane.f32.xlu0 %v425_v9 }
 0x182   : > { %v427_v10 = vpop.xlane.xlu0 %426 }
 0x183   : > { %429 = vst.msk [vmem:[%s256_s22] sm:$0xff] %vm428_vm2, %v427_v10 }
 0x1c5   : > { %v410_v11 = vpop.f32.mrb[0].mxu1 }
 0x1c6   : > { %v414_v12 = vsub.f32 %v261_v2, %v410_v11  ;;  %v608_v14 = vpop.f32.mrb[1].mxu1 }
 0x1c8   : > { %v416_v15 = vadd.f32 %v415_v13, %v414_v12 }
 0x1ca   : > { %417 = vst.msk [vmem:[%s238_s5] sm:$0xff] %vm265_vm1, %v416_v15 }
 0x1cb   : > { %679 = shalt.err (!%p676_p5)
}
 0x1cc   : > { %s680_s13 = scalar_lea.hbm %s851_s9, 128  ;;  %s684_s22 = scalar_lea.hbm %s903_s4, 256 }
 0x1cd   : > { %p681_p6 = scmp.ne.s32.totalorder %s851_s9, %s680_s13  ;;  %p685_p10 = scmp.lt.u32.totalorder %s851_s9, %s903_s4 }
 0x1ce   : > { %p686_p11 = scmp.lt.u32.totalorder %s684_s22, %s680_s13  ;;  %p688_p13 = scmp.lt.u32.totalorder %s680_s13, %s851_s9 }
 0x1cf   : > { %p682_p7 = pnand %p681_p6, %p814_p4 }
 0x1d0   : > { %p687_p12 = por %p686_p11, %p685_p10 }
 0x1d1   : > { %p683_p9 = pneg %p682_p7 }
 0x1d2   : > { %p689_p0 = por %p688_p13, %p687_p12 }
 0x1d4   : > { %p690_p1 = pnand %p689_p0, %p683_p9 }
 0x1d6   : > { %693 = shalt.err (!%p690_p1)
}
 0x1d7   : > { %609 = dma.vmem_to_hbm [thread:$0]  (%p814_p4), %s853_s6, 128, %s851_s9, %s438_s30  }
 0x1d8 PF: > { %p615_p2 = scmp.ge.s32.totalorder %s744_s20, 2  ;;  %s477_s29 = sand.u32 1, %s724_s15  }
 0x1d9   : > { %s478_s5 = scalar_lea.sflag [#allocation3], %s477_s29 }
 0x1da   : > { %p612_p3 = pnand %p615_p2, %p821_p8 }
 0x1dc   : > { %719 = dma.done.wait (!%p612_p3), %s478_s5, 128  }
 0x1dd   : > { %721 = vsyncadd (!%p612_p3), %s478_s5, 4294967168  ;;  %s18_s20 = sadd.s32 1, %s744_s20   ;;  %s906_s15 = smov %s728_s16 }
 0x1de   : > { %p15_p5 = scmp.ge.s32.totalorder %s18_s20, 4   ;;  %s907_s16 = smov %s732_s17 }
 0x1df   : > { %s908_s17 = smov %s827_s28  ;;  %s909_s18 = smov %s740_s19 }
 0x1e0   : > { %s910_s19 = smov %s912_s23  ;;  %17 = sbr.rel (!%p15_p5) target bundleno = 4 (0x4), region = 87 }
 0x1e7   :  { %483 = vsyncpa [#allocation3], 1 }
 0x1e8   :  { %485 = vsyncpa [#allocation3 + $0x1], 1 }

// kernel: gpr_forward.2
= control target key start
LH: loop header
LB: loop body
LE: loop exit
PB: predicated region body
PF: predicated region fallthrough
CT: control target
= control target key end

     0   :  { %9 = vsyncpa [#allocation3], 0  ;;  %s1146_s0 = inlined_call_operand.vmem [shape: f32[2], index: 0, kind: input, shape index: {}]   ;;  %s1147_s1 = inlined_call_operand.vmem [shape: f32[2], index: 1, kind: input, shape index: {}]   ;;  %s1148_s2 = inlined_call_operand.vmem [shape: f32[8,4], index: 2, kind: input, shape index: {}]   ;;  %s1149_s3 = inlined_call_operand.vmem [shape: f32[4,8], index: 3, kind: input, shape index: {}]   ;;  %s1150_s4 = inlined_call_operand.vmem [shape: f32[2,8,8], index: 4, kind: output, shape index: {}]  }
   0x1   :  { %10 = vsyncpa [#allocation5], 0  ;;  %s1046_s15 = smov 0   ;;  %s1048_s16 = smov 0  }
   0x2   :  { %s1050_s17 = smov 0  }
   0x3 LB: > { %s838_s18 = sadd.s32 4294967295, %s1015_s17   ;;  %s28_s19 = sadd.s32 1, %s1011_s16  ;;  %s1015_s17 = sphi %s1050_s17, %s16_s17   ;;  %s1011_s16 = sphi %s1048_s16, %s1160_s16   ;;  %s1007_s15 = sphi %s1046_s15, %s1159_s15  }
   0x4   : > { %p30_p0 = scmp.ge.s32.totalorder %s28_s19, 2  ;;  %p840_p1 = scmp.ge.s32.totalorder %s1015_s17, 1 }
   0x5   : > { %p150_p2 = scmp.lt.s32.totalorder %s1015_s17, 3  ;;  %p1071_p4 = scmp.eq.s32.totalorder %s838_s18, 0 }
   0x6   : > { %s1162_s19 = smov (%p30_p0, %s28_s19), 0  ;;  %s163_s24 = sshll.u32 %s1146_s0, 4  ;;  %s164_s24 = int_to_ptr.vmem [resolvable:$true] %s163_s24 }
   0x7   : > { %p1067_p3 = pnand %p840_p1, %p150_p2  ;;  %s174_s27 = sshll.u32 %s1147_s1, 4  ;;  %s175_s27 = int_to_ptr.vmem [resolvable:$true] %s174_s27 }
   0x8   : > { %s1155_s21 = scalar_select %p1071_p4, 1, 0 }
   0x9   : > { %s1154_s20 = scalar_select %p1067_p3, 1, 0 }
   0xa   : > { %p912_p5 = pneg %p1067_p3  ;;  %s955_s29 = scalar_lea.vmem %s164_s24, 16 }
   0xb   : > { %p956_p7 = scmp.ne.s32.totalorder %s164_s24, %s955_s29  ;;  %p963_p11 = scmp.lt.s32.totalorder %s164_s24, %s164_s24 }
   0xc   : > { %p1085_p6 = pnand %p1071_p4, %p912_p5  ;;  %p964_p12 = scmp.lt.s32.totalorder %s955_s29, %s955_s29 }
   0xe   : > { %p957_p8 = pneg %p1085_p6  ;;  %p965_p13 = por %p964_p12, %p963_p11 }
  0x10   : > { %p958_p9 = pnand %p957_p8, %p956_p7 }
  0x12   : > { %p959_p10 = pneg %p958_p9 }
  0x14   : > { %p966_p0 = pnand %p965_p13, %p959_p10 }
  0x16   : > { %969 = shalt.err (!%p966_p0)
}
  0x17   : > { %s1017_s30 = smov [#allocation2]   ;;  %s970_s5 = scalar_lea.vmem %s175_s27, 16 }
  0x18   : > { %915 = dma.vmem_to_smem (!%p1085_p6), %s164_s24, 16, %s1017_s30, [#allocation3]  }
  0x19   : > { %p971_p1 = scmp.ne.s32.totalorder %s175_s27, %s970_s5  ;;  %p978_p4 = scmp.lt.s32.totalorder %s175_s27, %s175_s27 }
  0x1a   : > { %p979_p3 = scmp.lt.s32.totalorder %s970_s5, %s970_s5 }
  0x1b   : > { %p973_p2 = pnand %p971_p1, %p957_p8 }
  0x1c   : > { %p980_p7 = por %p979_p3, %p978_p4 }
  0x1d   : > { %p974_p5 = pneg %p973_p2 }
  0x1f   : > { %p981_p9 = pnand %p980_p7, %p974_p5 }
  0x21   : > { %984 = shalt.err (!%p981_p9)
}
  0x22   : > { %s1018_s6 = smov [#allocation4]   ;;  %p1157_p10 = scmp.ne.s32.totalorder %s1154_s20, 0 }
  0x23   : > { %918 = dma.vmem_to_smem (!%p1085_p6), %s175_s27, 16, %s1018_s6, [#allocation5]  }
  0x24   : > { %197 = sbr.rel (%p1157_p10) target bundleno = 317 (0x13d), region = 36  ;;  %p1158_p11 = scmp.ne.s32.totalorder (!%p1157_p10), %s1155_s21, 0 }
  0x2b   : > { %998 = dma.done.wait (%p1158_p11), [#allocation3], 16  }
  0x2c   : > { %1000 = vsyncadd (%p1158_p11), [#allocation3], 4294967280 }
  0x2d   : > { %1002 = dma.done.wait (%p1158_p11), [#allocation5], 16  }
  0x2e   : > { %1004 = vsyncadd (%p1158_p11), [#allocation5], 4294967280 }
  0x2f   : > { %207 = sfence }
  0x30   : > { %v241_v0 = vld [vmem:[%s1149_s3] sm:$0xf]  ;;  %vm259_vm0 = vcmask 1043456   ;;  %v1019_v2 = vmov 0.0   ;;  %vm1020_vm1 = vmmov 0   ;;  %vm243_vm2 = vcmask 31744  }
  0x31   : > { %v240_v1 = vld [vmem:[%s1148_s2] sm:$0xff]  ;;  %878 = vmatprep.subr.mxu0 %v1019_v2  ;;  %v261_v3 = vsel %vm259_vm0, %v241_v0, 0  ;;  %880 = vmatprep.mubr.msk.f32.mxu0 %vm1020_vm1, %v1019_v2  ;;  %s714_s11 = sld [smem:[#allocation4 + %s1007_s15]]  ;;  %v247_v19 = vmul.f32 %v241_v0, %v241_v0  ;;  %vm248_vm3 = vcmask 60416   ;;  %v727_v38 = vlaneseq  ;;  %p233_p3 = scmp.lt.s32.totalorder %s1007_s15, 1 }
  0x32   : > { %v242_v4 = vmul.f32 %v240_v1, %v240_v1  ;;  %v264_v5 = vand.u32 4294901760, %v261_v3  ;;  %v257_v6 = vsel %vm243_vm2, %v240_v1, 0  ;;  %863 = vmatprep.subr.mxu1 %v1019_v2  ;;  %865 = vmatprep.mubr.msk.f32.mxu1 %vm1020_vm1, %v1019_v2  ;;  %s713_s18 = sld [smem:[#allocation2 + %s1007_s15]]  ;;  %vm739_vm5 = vcmask 64512  }
  0x33   : > { %v329_v7 = vand.u32 4294901760, %v257_v6  ;;  %v249_v20 = vsel %vm248_vm3, %v247_v19, 0.0  ;;  %v728_v41 = vshrl.u32 %v727_v38, 7  ;;  %v733_v42 = vand.u32 127, %v727_v38  ;;  %s1164_s15 = smov (!%p233_p3, %s1007_s15), 1 }
  0x34   : > { %v244_v8 = vsel %vm243_vm2, %v242_v4, 0.0  ;;  %v341_v9 = vsub.f32 %v261_v3, %v264_v5  ;;  %879 = vmatpush3.msra.mxu0 %v264_v5  ;;  %864 = vmatpush3.msra.mxu1 %v264_v5  ;;  %v250_v21 = vrot.slane %v249_v20, 4  ;;  %s847_s21 = sshll.u32 %s1164_s15, 3 }
  0x35   : > { %v330_v10 = vsub.f32 %v257_v6, %v329_v7  ;;  %868 = vmatprep.subr.mxu1 %v1019_v2  ;;  %883 = vmatprep.subr.mxu0 %v1019_v2  ;;  %vm734_vm4 = vcmp.eq.s32.totalorder %v728_v41, %v733_v42  ;;  %s239_s24 = scalar_lea.vmem %s1150_s4, %s847_s21 }
  0x36   : > { %v342_v11 = vand.u32 4294901760, %v341_v9  ;;  %245 = vadd.xlane.f32.xlu0 %v244_v8  ;;  %v251_v22 = vadd.f32 %v250_v21, %v249_v20  ;;  %v848_v43 = vsel %vm734_vm4, 1.0, %v1019_v2 }
  0x37   : > { %v331_v12 = vand.u32 4294901760, %v330_v10  ;;  %s716_s12 = smul.f32 %s714_s11, %s714_s11  ;;  %v737_v45 = vmul.f32 0.002, %v848_v43 }
  0x38   : > { %v343_v13 = vsub.f32 %v341_v9, %v342_v11  ;;  %v252_v23 = vrot.slane %v251_v22, 2  ;;  %s715_s20 = smul.f32 %s713_s18, %s713_s18 }
  0x39   : > { %881 = vmatmul.mubr.f32.vlgmr.msra.gmra.mrb[0].mxu0 %v331_v12  ;;  %v332_v14 = vsub.f32 %v330_v10, %v331_v12  ;;  %v717_v15 = vstv %s716_s12 }
  0x3a   : > { %v344_v16 = vand.u32 4294901760, %v343_v13  ;;  %884 = vmatpush3.msra.mxu0 %v342_v11  ;;  %885 = vmatprep.mubr.msk.f32.mxu0 %vm1020_vm1, %v1019_v2  ;;  %951 = vrcp.f32 %v717_v15  ;;  %v253_v24 = vadd.f32 %v252_v23, %v251_v22  ;;  %v725_v44 = vstv %s715_s20 }
  0x3b   : > { %v333_v17 = vand.u32 4294901760, %v332_v14  ;;  %888 = vmatprep.subr.mxu0 %v1019_v2 }
  0x3c   : > { %v254_v25 = vrot.slane %v253_v24, 1 }
  0x3d   : > { %866 = vmatmul.mubr.f32.vlgmr.msra.gmra.mrb[0].mxu1 %v333_v17 }
  0x3e   : > { %869 = vmatpush3.msra.mxu1 %v344_v16  ;;  %870 = vmatprep.mubr.msk.f32.mxu1 %vm1020_vm1, %v1019_v2  ;;  %v255_v28 = vadd.f32 %v254_v25, %v253_v24 }
  0x3f   : > { %873 = vmatprep.subr.mxu1 %v1019_v2 }
  0x41   : > { %886 = vmatmul.mubr.f32.vlgmr.msra.gmra.mrb[0].mxu0 %v329_v7 }
  0x42   : > { %889 = vmatpush3.msra.mxu0 %v264_v5  ;;  %890 = vmatprep.mubr.msk.f32.mxu0 %vm1020_vm1, %v1019_v2 }
  0x44   : > { %v952_v18 = vpop.eup %951 }
  0x45   : > { %871 = vmatmul.mubr.f32.vlgmr.msra.gmra.mrb[0].mxu1 %v329_v7  ;;  %902 = vpush %v952_v18 }
  0x46   : > { %874 = vmatpush3.msra.mxu1 %v341_v9  ;;  %875 = vmatprep.mubr.msk.f32.mxu1 %vm1020_vm1, %v1019_v2 }
  0x49   : > { %891 = vmatmul.mubr.f32.vlgmr.msra.gmra.mrb[0].mxu0 %v329_v7 }
  0x4d   : > { %876 = vmatmul.mubr.f32.vlgmr.msra.gmra.mrb[0].mxu1 %v330_v10 }
  0x76   : > { %s903_s13 = spop %902 }
  0x77   : > { %s720_s14 = smul.f32 -0.5, %s903_s13 }
  0x79   : > { %v721_v36 = vstv %s720_s14 }
  0xc3   : > { %v246_v29 = vpop.xlane.xlu0 %245 }
  0xc4   : > { %v709_v33 = vadd.f32 %v255_v28, %v246_v29 }
 0x11c   : > { %v705_v26 = vpop.f32.mrb[0].mxu0 }
 0x11d   : > { %v892_v27 = vpop.f32.mrb[1].mxu0 }
 0x120   : > { %v485_v30 = vpop.f32.mrb[0].mxu1 }
 0x121   : > { %v893_v31 = vadd.f32 %v705_v26, %v485_v30  ;;  %v877_v32 = vpop.f32.mrb[1].mxu1 }
 0x123   : > { %v710_v34 = vmul.f32 2.0, %v893_v31 }
 0x125   : > { %v711_v35 = vsub.f32 %v709_v33, %v710_v34 }
 0x127   : > { %v712_v37 = vmax.f32 %v711_v35, 0.0 }
 0x129   : > { %v722_v39 = vmul.f32 %v721_v36, %v712_v37 }
 0x12b   : > { %v723_v40 = vmul.f32 1.442695, %v722_v39 }
 0x12d   : > { %953 = vpow2.f32 %v723_v40 }
 0x137   : > { %v954_v46 = vpop.eup %953 }
 0x138   : > { %v726_v47 = vmul.f32 %v954_v46, %v725_v44 }
 0x13a   : > { %v738_v48 = vadd.f32 %v737_v45, %v726_v47 }
 0x13c   : > { %740 = vst.msk [vmem:[%s239_s24] sm:$0xff] %vm739_vm5, %v738_v48 }
 0x13d PF: > { %s16_s17 = sadd.s32 1, %s1015_s17   ;;  %s1159_s15 = smov %s1011_s16 }
 0x13e   : > { %p13_p4 = scmp.ge.s32.totalorder %s16_s17, 4   ;;  %s1160_s16 = smov %s1162_s19 }
 0x140   :  { %15 = sbr.rel (!%p13_p4) target bundleno = 3 (0x3), region = 75 }
 0x147   :  { %766 = vsyncpa [#allocation3], 1 }
 0x148   :  { %768 = vsyncpa [#allocation3 + $0x1], 1 }
 0x149   :  { %769 = vsyncpa [#allocation5], 1 }

</bundles_post_ra>
